<compile_context>
chip_gen: v7x
topology: tpu7x:2x2x1
jax: 0.10.0
libtpu: 0.0.40
codegen_flags: <defaults>
</compile_context>

<pallas_src>
import jax
import jax.numpy as jnp
from jax.experimental import pallas as pl
from jax.experimental.pallas import tpu as pltpu

EPS = 1e-5
DROP_P = 0.5  # F.dropout default (training=True in the reference module)


def _round_up(x, m):
    return ((x + m - 1) // m) * m


# ---------------------------------------------------------------------------
# Pass 0: node-wise linear transform  H = X @ W^T + b   (row-tiled)
# ---------------------------------------------------------------------------
def transform_kernel(x_ref, wt_ref, b_ref, h_ref):
    h = jnp.dot(x_ref[...], wt_ref[...], preferred_element_type=jnp.float32)
    h = h + b_ref[...]
    h_ref[...] = h.astype(h_ref.dtype)   # stored as bf16 to halve HBM traffic


# ---------------------------------------------------------------------------
# Pass 1: Y_pre = dropout(relu(Ahat @ H)), tiled over (row tiles, K tiles),
#         plus per-row-tile per-channel sum / sum-of-squares for BatchNorm.
# ---------------------------------------------------------------------------
def aggregate_kernel(ahat_ref, h_ref, mask_ref, y_ref, stats_ref, acc_ref):
    k = pl.program_id(1)

    @pl.when(k == 0)
    def _():
        acc_ref[...] = jnp.zeros_like(acc_ref)

    # bf16 operands, f32 accumulation on the MXU.
    acc_ref[...] += jnp.dot(ahat_ref[...], h_ref[...],
                            preferred_element_type=jnp.float32)

    @pl.when(k == pl.num_programs(1) - 1)
    def _():
        y = jnp.maximum(acc_ref[...], 0.0)                      # ReLU
        y = y * (mask_ref[...] * (1.0 / (1.0 - DROP_P)))        # inverted dropout
        y_ref[...] = y.astype(y_ref.dtype)

        # Per-channel partial statistics for this row tile (rows 0/1 of an
        # 8-sublane block: sum, sum-of-squares).  Padded rows are exact zeros
        # (Ahat padded rows are zero), so they do not perturb the stats.
        c = y.shape[1]
        s = jnp.sum(y, axis=0, keepdims=True)                   # [1, C]
        ss = jnp.sum(y * y, axis=0, keepdims=True)              # [1, C]
        row = jax.lax.broadcasted_iota(jnp.int32, (8, c), 0)
        stats_tile = jnp.where(row == 0, jnp.broadcast_to(s, (8, c)),
                               jnp.where(row == 1, jnp.broadcast_to(ss, (8, c)),
                                         0.0))
        stats_ref[0] = stats_tile


# ---------------------------------------------------------------------------
# Pass 2: BatchNorm apply  out = y * scale + shift   (row-tiled, lane-dense)
# ---------------------------------------------------------------------------
def bn_apply_kernel(y_ref, scale_ref, shift_ref, o_ref):
    o_ref[...] = (y_ref[...] * scale_ref[...] + shift_ref[...]).astype(o_ref.dtype)


# ---------------------------------------------------------------------------
# Graph densification: Ahat = D^-1/2 (A + I) D^-1/2  (PyG GCNConv default)
# ---------------------------------------------------------------------------
def build_ahat(edge_index, num_nodes):
    src, dst = edge_index[0], edge_index[1]
    m = jnp.zeros((num_nodes, num_nodes), jnp.float32)
    m = m.at[dst, src].add(1.0)                      # message j -> i: row i, col j
    m = m + jnp.eye(num_nodes, dtype=jnp.float32)    # self loops
    deg = jnp.sum(m, axis=1)
    d_inv_sqrt = jnp.where(deg > 0, 1.0 / jnp.sqrt(deg), 0.0)
    return d_inv_sqrt[:, None] * m * d_inv_sqrt[None, :]


# ---------------------------------------------------------------------------
# Wrapper
# ---------------------------------------------------------------------------
def chem_conv_block(x, edge_index, weight, bias, gamma, beta, *, dropout_key=None):
    n, c_in = x.shape
    c_out = weight.shape[0]

    # Pad nodes to a multiple of 128 (Ahat lane dim) and channels to 128 lanes
    # so all loads/stores are lane-dense.
    n_pad = max(_round_up(n, 128), 128)
    cin_pad = _round_up(c_in, 128)
    cout_pad = _round_up(c_out, 128)

    # Tile sizes: biggest clean divisors; per-step VMEM (double-buffered bf16
    # Ahat/H tiles + f32 accumulator + output/mask tiles) stays well under the
    # v7x 64 MiB budget (and v5e's 16 MiB default scope), so no vmem_limit bump
    # is needed.
    tm = 256 if n_pad % 256 == 0 else 128
    tk = 512 if n_pad % 512 == 0 else (256 if n_pad % 256 == 0 else 128)
    num_i = n_pad // tm
    num_k = n_pad // tk

    # --- host-side prep (padding, adjacency, dropout mask) ------------------
    ahat = build_ahat(edge_index, n)
    ahat_p = jnp.zeros((n_pad, n_pad), jnp.float32).at[:n, :n].set(ahat)
    ahat_bf16 = ahat_p.astype(jnp.bfloat16)          # normalization weights <= 1

    x_p = jnp.zeros((n_pad, cin_pad), jnp.float32).at[:n, :c_in].set(x)
    wt_p = jnp.zeros((cin_pad, cout_pad), jnp.float32).at[:c_in, :c_out].set(weight.T)
    b_p = jnp.zeros((1, cout_pad), jnp.float32).at[0, :c_out].set(bias)
    gamma_p = jnp.zeros((cout_pad,), jnp.float32).at[:c_out].set(gamma)
    beta_p = jnp.zeros((cout_pad,), jnp.float32).at[:c_out].set(beta)

    if dropout_key is None:
        dropout_key = jax.random.PRNGKey(0)
    keep = jax.random.bernoulli(dropout_key, 1.0 - DROP_P,
                                (n_pad, cout_pad)).astype(jnp.float32)

    # --- Pass 0: H = X @ W^T + b --------------------------------------------
    h_bf16 = pl.pallas_call(
        transform_kernel,
        out_shape=jax.ShapeDtypeStruct((n_pad, cout_pad), jnp.bfloat16),
        grid=(num_i,),
        in_specs=[pl.BlockSpec((tm, cin_pad), lambda i: (i, 0)),
                  pl.BlockSpec((cin_pad, cout_pad), lambda i: (0, 0)),
                  pl.BlockSpec((1, cout_pad), lambda i: (0, 0))],
        out_specs=pl.BlockSpec((tm, cout_pad), lambda i: (i, 0)),
        compiler_params=pltpu.CompilerParams(dimension_semantics=("parallel",)),
    )(x_p, wt_p, b_p)

    # --- Pass 1: aggregation + ReLU + dropout + BN statistics ---------------
    y_pre, stats = pl.pallas_call(
        aggregate_kernel,
        out_shape=(jax.ShapeDtypeStruct((n_pad, cout_pad), jnp.float32),
                   jax.ShapeDtypeStruct((num_i, 8, cout_pad), jnp.float32)),
        grid=(num_i, num_k),
        in_specs=[pl.BlockSpec((tm, tk), lambda i, k: (i, k)),
                  pl.BlockSpec((tk, cout_pad), lambda i, k: (k, 0)),
                  pl.BlockSpec((tm, cout_pad), lambda i, k: (i, 0))],
        out_specs=(pl.BlockSpec((tm, cout_pad), lambda i, k: (i, 0)),
                   pl.BlockSpec((1, 8, cout_pad), lambda i, k: (i, 0, 0))),
        scratch_shapes=[pltpu.VMEM((tm, cout_pad), jnp.float32)],
        compiler_params=pltpu.CompilerParams(
            dimension_semantics=("parallel", "arbitrary")),
    )(ahat_bf16, h_bf16, keep)

    # --- fold batch statistics into an affine scale/shift (tiny, host-side) --
    n_f = jnp.float32(n)
    ch_sum = jnp.sum(stats[:, 0, :], axis=0)
    ch_sumsq = jnp.sum(stats[:, 1, :], axis=0)
    mean = ch_sum / n_f
    var = jnp.maximum(ch_sumsq / n_f - mean * mean, 0.0)   # biased (training BN)
    inv_std = jax.lax.rsqrt(var + EPS)
    scale = (gamma_p * inv_std).reshape(1, cout_pad)
    shift = (beta_p - mean * gamma_p * inv_std).reshape(1, cout_pad)

    # --- Pass 2: apply BatchNorm ---------------------------------------------
    out_pad = pl.pallas_call(
        bn_apply_kernel,
        out_shape=jax.ShapeDtypeStruct((n_pad, cout_pad), jnp.float32),
        grid=(num_i,),
        in_specs=[pl.BlockSpec((tm, cout_pad), lambda i: (i, 0)),
                  pl.BlockSpec((1, cout_pad), lambda i: (0, 0)),
                  pl.BlockSpec((1, cout_pad), lambda i: (0, 0))],
        out_specs=pl.BlockSpec((tm, cout_pad), lambda i: (i, 0)),
        compiler_params=pltpu.CompilerParams(dimension_semantics=("parallel",)),
    )(y_pre, scale, shift)

    return out_pad[:n, :c_out]


if __name__ == "__main__":
    key = jax.random.PRNGKey(0)
    k_x, k_w, k_b, k_drop = jax.random.split(key, 4)

    N, C_IN, C_OUT = 8, 16, 32

    # Node features.
    x = jax.random.normal(k_x, (N, C_IN), dtype=jnp.float32)

    # Ring graph in both directions (COO edge_index, PyG convention).
    fwd = jnp.stack([jnp.arange(N), (jnp.arange(N) + 1) % N])
    bwd = jnp.stack([(jnp.arange(N) + 1) % N, jnp.arange(N)])
    edge_index = jnp.concatenate([fwd, bwd], axis=1).astype(jnp.int32)  # [2, 2N]

    # Deterministic parameter init (GCNConv linear + bias, BatchNorm affine).
    weight = jax.random.normal(k_w, (C_OUT, C_IN), dtype=jnp.float32) * 0.1
    bias = jax.random.normal(k_b, (C_OUT,), dtype=jnp.float32) * 0.01
    gamma = jnp.ones((C_OUT,), dtype=jnp.float32)
    beta = jnp.zeros((C_OUT,), dtype=jnp.float32)

    out = chem_conv_block(x, edge_index, weight, bias, gamma, beta,
                          dropout_key=k_drop)
    jax.block_until_ready(out)
    assert out.shape == (N, C_OUT) and out.dtype == jnp.float32
    assert bool(jnp.all(jnp.isfinite(out)))
    print("KERNEL_OK")
</pallas_src>

<mosaic_0001>
module attributes {stable_mosaic.version = 11 : i64} {
  func.func @transform_kernel(%arg0: i32, %arg1: memref<128x128xf32, #tpu.memory_space<vmem>>, %arg2: memref<128x128xf32, #tpu.memory_space<vmem>>, %arg3: memref<1x128xf32, #tpu.memory_space<vmem>>, %arg4: memref<128x128xbf16, #tpu.memory_space<vmem>>) attributes {dimension_semantics = [#tpu.dimension_semantics<parallel>], iteration_bounds = array<i64: 1>, scalar_prefetch = 0 : i64, scratch_operands = 0 : i64, tpu.core_type = #tpu.core_type<tc>, window_params = [{transform_indices = @transform_0, window_bounds = array<i64: 128, 128>}, {pipeline_mode = #tpu.pipeline_mode<synchronous>, transform_indices = @transform_1, window_bounds = array<i64: 128, 128>}, {pipeline_mode = #tpu.pipeline_mode<synchronous>, transform_indices = @transform_2, window_bounds = array<i64: 1, 128>}, {transform_indices = @transform_3, window_bounds = array<i64: 128, 128>}]} {
    %c0 = arith.constant 0 : index
    %c0_0 = arith.constant 0 : index
    %0 = vector.load %arg1[%c0, %c0_0] : memref<128x128xf32, #tpu.memory_space<vmem>>, vector<128x128xf32>
    %c0_1 = arith.constant 0 : index
    %c0_2 = arith.constant 0 : index
    %1 = vector.load %arg2[%c0_1, %c0_2] : memref<128x128xf32, #tpu.memory_space<vmem>>, vector<128x128xf32>
    %cst = arith.constant dense<0.000000e+00> : vector<128x128xf32>
    %2 = tpu.matmul %0, %1, %cst {dimension_numbers = #tpu.dot_dimension_numbers<[1], [0], [0], [1], [0, 0, 1, 1], [], []>} : vector<128x128xf32>, vector<128x128xf32>, vector<128x128xf32> -> vector<128x128xf32>
    %c0_3 = arith.constant 0 : index
    %c0_4 = arith.constant 0 : index
    %3 = vector.load %arg3[%c0_3, %c0_4] : memref<1x128xf32, #tpu.memory_space<vmem>>, vector<1x128xf32>
    %4 = vector.broadcast %3 : vector<1x128xf32> to vector<128x128xf32>
    %5 = arith.addf %2, %4 : vector<128x128xf32>
    %6 = arith.truncf %5 : vector<128x128xf32> to vector<128x128xbf16>
    %c0_5 = arith.constant 0 : index
    %c0_6 = arith.constant 0 : index
    %7 = vector.load %arg4[%c0_5, %c0_6] : memref<128x128xbf16, #tpu.memory_space<vmem>>, vector<128x128xbf16>
    tpu.vector_store %arg4[%c0_5, %c0_6], %6 {strides = array<i32>} : memref<128x128xbf16, #tpu.memory_space<vmem>>, vector<128x128xbf16>,
    return
  }
  func.func @transform_0(%arg0: i32) -> (i32, i32) {
    %c0_i32 = arith.constant 0 : i32
    %c0_i32_0 = arith.constant 0 : i32
    return %arg0, %c0_i32 : i32, i32
  }
  func.func @transform_1(%arg0: i32) -> (i32, i32) {
    %c0_i32 = arith.constant 0 : i32
    %c0_i32_0 = arith.constant 0 : i32
    %c0_i32_1 = arith.constant 0 : i32
    return %c0_i32, %c0_i32_0 : i32, i32
  }
  func.func @transform_2(%arg0: i32) -> (i32, i32) {
    %c0_i32 = arith.constant 0 : i32
    %c0_i32_0 = arith.constant 0 : i32
    %c0_i32_1 = arith.constant 0 : i32
    return %c0_i32, %c0_i32_0 : i32, i32
  }
  func.func @transform_3(%arg0: i32) -> (i32, i32) {
    %c0_i32 = arith.constant 0 : i32
    %c0_i32_0 = arith.constant 0 : i32
    return %arg0, %c0_i32 : i32, i32
  }
}

</mosaic_0001>

<bundles_post_ra>
// kernel: tpu_custom_call.1
= control target key start
LH: loop header
LB: loop body
LE: loop exit
PB: predicated region body
PF: predicated region fallthrough
CT: control target
= control target key end

     0   :  { %8 = vsyncpa [#allocation3], 0  ;;  %s686_s0 = inlined_call_operand.hbm [shape: f32[128,128], index: 0, kind: input, shape index: {}]   ;;  %s687_s1 = inlined_call_operand.hbm [shape: f32[128,128], index: 1, kind: input, shape index: {}]   ;;  %s688_s2 = inlined_call_operand.vmem [shape: f32[1,128], index: 2, kind: input, shape index: {}]   ;;  %s689_s3 = inlined_call_operand.hbm [shape: bf16[128,128], index: 3, kind: output, shape index: {}]  }
   0x1   :  { %9 = vsyncpa [#allocation6], 0 }
   0x2   :  { %10 = vsyncpa [#allocation4], 0  ;;  %s620_s12 = smov [#allocation2]   ;;  %s548_s16 = scalar_lea.hbm %s686_s0, 2048 }
   0x3   :  { %s16_s13 = sshll.u32 %s620_s12, 4  ;;  %p549_p0 = scmp.ne.s32.totalorder %s686_s0, %s548_s16  ;;  %s17_s13 = int_to_ptr.vmem [resolvable:$true] %s16_s13 }
   0x4   :  { %p552_p1 = scmp.lt.u32.totalorder %s548_s16, %s686_s0 }
   0x6   :  { %p554_p2 = pnand %p552_p1, %p549_p0 }
   0x8   :  { %557 = shalt.err (!%p554_p2)
}
   0x9   :  { %s558_s21 = scalar_lea.vmem %s17_s13, 2048  ;;  %p563_p4 = scmp.lt.s32.totalorder %s17_s13, %s17_s13 }
   0xa   :  { %p559_p3 = scmp.ne.s32.totalorder %s17_s13, %s558_s21  ;;  %p564_p5 = scmp.lt.s32.totalorder %s558_s21, %s558_s21 }
   0xc   :  { %p565_p6 = por %p564_p5, %p563_p4 }
   0xe   :  { %p566_p7 = pnand %p565_p6, %p559_p3 }
  0x10   :  { %569 = shalt.err (!%p566_p7)
}
  0x11   :  { %s621_s22 = smov 128   ;;  %s622_s23 = smov 8  }
  0x12   :  { %22 = dma.hbm_to_vmem [thread:$0]  %s686_s0, 2048, %s17_s13, [#allocation3], %s621_s22, %s621_s22, %s622_s23  }
  0x13   :  { %s623_s26 = smov [#allocation5]   ;;  %s570_s30 = scalar_lea.hbm %s687_s1, 2048 }
  0x14   :  { %s28_s27 = sshll.u32 %s623_s26, 4  ;;  %p571_p8 = scmp.ne.s32.totalorder %s687_s1, %s570_s30  ;;  %s29_s27 = int_to_ptr.vmem [resolvable:$true] %s28_s27 }
  0x15   :  { %p574_p9 = scmp.lt.u32.totalorder %s570_s30, %s687_s1 }
  0x17   :  { %p576_p10 = pnand %p574_p9, %p571_p8 }
  0x19   :  { %579 = shalt.err (!%p576_p10)
}
  0x1a   :  { %s580_s8 = scalar_lea.vmem %s29_s27, 2048  ;;  %p585_p12 = scmp.lt.s32.totalorder %s29_s27, %s29_s27 }
  0x1b   :  { %p581_p11 = scmp.ne.s32.totalorder %s29_s27, %s580_s8  ;;  %p586_p13 = scmp.lt.s32.totalorder %s580_s8, %s580_s8 }
  0x1d   :  { %p587_p0 = por %p586_p13, %p585_p12 }
  0x1f   :  { %p588_p1 = pnand %p587_p0, %p581_p11 }
  0x21   :  { %591 = shalt.err (!%p588_p1)
}
  0x22   :  { %34 = dma.hbm_to_vmem [thread:$0]  %s687_s1, 2048, %s29_s27, [#allocation6], %s621_s22, %s621_s22, %s622_s23  }
  0x23   :  { %614 = dma.done.wait [#allocation3], 2048  }
  0x24   :  { %615 = vsyncadd [#allocation3], 4294965248 }
  0x25   :  { %616 = dma.done.wait [#allocation6], 2048  }
  0x26   :  { %617 = vsyncadd [#allocation6], 4294965248  ;;  %v59_v0 = vld [vmem:[#allocation5] sm:$0xff]  ;;  %v60_v1 = vld [vmem:[#allocation5 + $0x8] sm:$0xff] }
  0x27   :  { %v61_v2 = vld [vmem:[#allocation5 + $0x10] sm:$0xff]  ;;  %v493_v3 = vpack.c.bf16 %v60_v1, %v59_v0  ;;  %v62_v4 = vld [vmem:[#allocation5 + $0x18] sm:$0xff]  ;;  %v63_v6 = vld [vmem:[#allocation5 + $0x20] sm:$0xff] }
  0x28   :  { %v497_v5 = vpack.c.bf16 %v62_v4, %v61_v2  ;;  %v64_v7 = vld [vmem:[#allocation5 + $0x28] sm:$0xff]  ;;  %v43_v9 = vld [vmem:[#allocation2] sm:$0xff]  ;;  %v65_v11 = vld [vmem:[#allocation5 + $0x30] sm:$0xff] }
  0x29   :  { %494 = vmatprep.subr.bf16.mxu0 %v493_v3  ;;  %525 = vmatprep.subr.bf16.mxu1 %v493_v3  ;;  %v501_v8 = vpack.c.bf16 %v64_v7, %v63_v6  ;;  %v51_v10 = vld [vmem:[#allocation2 + $0x40] sm:$0xff]  ;;  %v66_v12 = vld [vmem:[#allocation5 + $0x38] sm:$0xff]  ;;  %v68_v15 = vld [vmem:[#allocation5 + $0x48] sm:$0xff] }
  0x2a   :  { %496 = vmatpush3.bf16.msra.mxu0 %v493_v3  ;;  %533 = vmatpush3.bf16.msra.mxu1 %v493_v3  ;;  %v505_v13 = vpack.c.bf16 %v66_v12, %v65_v11  ;;  %v67_v14 = vld [vmem:[#allocation5 + $0x40] sm:$0xff]  ;;  %v69_v17 = vld [vmem:[#allocation5 + $0x50] sm:$0xff]  ;;  %v70_v18 = vld [vmem:[#allocation5 + $0x58] sm:$0xff] }
  0x2b   :  { %498 = vmatprep.subr.bf16.mxu0 %v497_v5  ;;  %526 = vmatprep.subr.bf16.mxu1 %v497_v5  ;;  %v509_v16 = vpack.c.bf16 %v68_v15, %v67_v14  ;;  %v513_v19 = vpack.c.bf16 %v70_v18, %v69_v17  ;;  %v71_v20 = vld [vmem:[#allocation5 + $0x60] sm:$0xff]  ;;  %v72_v21 = vld [vmem:[#allocation5 + $0x68] sm:$0xff]  ;;  %v73_v23 = vld [vmem:[#allocation5 + $0x70] sm:$0xff] }
  0x2c   :  { %469 = vmatprep.mubr.f32.mxu0 %v43_v9  ;;  %481 = vmatprep.mubr.f32.mxu1 %v51_v10  ;;  %v517_v22 = vpack.c.bf16 %v72_v21, %v71_v20  ;;  %v74_v24 = vld [vmem:[#allocation5 + $0x78] sm:$0xff]  ;;  %v44_v26 = vld [vmem:[#allocation2 + $0x8] sm:$0xff]  ;;  %v45_v28 = vld [vmem:[#allocation2 + $0x10] sm:$0xff] }
  0x2d   :  { %v521_v25 = vpack.c.bf16 %v74_v24, %v73_v23  ;;  %v52_v27 = vld [vmem:[#allocation2 + $0x48] sm:$0xff]  ;;  %v53_v29 = vld [vmem:[#allocation2 + $0x50] sm:$0xff]  ;;  %v46_v30 = vld [vmem:[#allocation2 + $0x18] sm:$0xff] }
  0x2e   :  { %500 = vmatpush3.bf16.msra.mxu0 %v497_v5  ;;  %534 = vmatpush3.bf16.msra.mxu1 %v497_v5  ;;  %v54_v31 = vld [vmem:[#allocation2 + $0x58] sm:$0xff]  ;;  %v47_v32 = vld [vmem:[#allocation2 + $0x20] sm:$0xff]  ;;  %v48_v34 = vld [vmem:[#allocation2 + $0x28] sm:$0xff] }
  0x2f   :  { %502 = vmatprep.subr.bf16.mxu0 %v501_v8  ;;  %527 = vmatprep.subr.bf16.mxu1 %v501_v8  ;;  %v55_v33 = vld [vmem:[#allocation2 + $0x60] sm:$0xff]  ;;  %v56_v35 = vld [vmem:[#allocation2 + $0x68] sm:$0xff]  ;;  %v49_v36 = vld [vmem:[#allocation2 + $0x30] sm:$0xff] }
  0x30   :  { %v57_v37 = vld [vmem:[#allocation2 + $0x70] sm:$0xff]  ;;  %v50_v38 = vld [vmem:[#allocation2 + $0x38] sm:$0xff]  ;;  %v325_v40 = vld [vmem:[%s688_s2] ss:$0 sm:$0xff]  ;;  %s624_s2 = smov [#allocation7]  }
  0x31   :  { %v58_v39 = vld [vmem:[#allocation2 + $0x78] sm:$0xff]  ;;  %s312_s11 = sshll.u32 %s624_s2, 4  ;;  %s313_s11 = int_to_ptr.vmem [resolvable:$true] %s312_s11 }
  0x32   :  { %504 = vmatpush3.bf16.msra.mxu0 %v501_v8  ;;  %535 = vmatpush3.bf16.msra.mxu1 %v501_v8  ;;  %s592_s12 = scalar_lea.vmem %s313_s11, 1024  ;;  %p597_p3 = scmp.lt.s32.totalorder %s313_s11, %s313_s11 }
  0x33   :  { %506 = vmatprep.subr.bf16.mxu0 %v505_v13  ;;  %528 = vmatprep.subr.bf16.mxu1 %v505_v13  ;;  %p593_p2 = scmp.ne.s32.totalorder %s313_s11, %s592_s12  ;;  %p598_p4 = scmp.lt.s32.totalorder %s592_s12, %s592_s12 }
  0x35   :  { %p599_p5 = por %p598_p4, %p597_p3 }
  0x36   :  { %508 = vmatpush3.bf16.msra.mxu0 %v505_v13  ;;  %536 = vmatpush3.bf16.msra.mxu1 %v505_v13 }
  0x37   :  { %510 = vmatprep.subr.bf16.mxu0 %v509_v16  ;;  %529 = vmatprep.subr.bf16.mxu1 %v509_v16  ;;  %p600_p6 = pnand %p599_p5, %p593_p2 }
  0x3a   :  { %512 = vmatpush3.bf16.msra.mxu0 %v509_v16  ;;  %537 = vmatpush3.bf16.msra.mxu1 %v509_v16 }
  0x3b   :  { %514 = vmatprep.subr.bf16.mxu0 %v513_v19  ;;  %530 = vmatprep.subr.bf16.mxu1 %v513_v19 }
  0x3e   :  { %516 = vmatpush3.bf16.msra.mxu0 %v513_v19  ;;  %538 = vmatpush3.bf16.msra.mxu1 %v513_v19 }
  0x3f   :  { %518 = vmatprep.subr.bf16.mxu0 %v517_v22  ;;  %531 = vmatprep.subr.bf16.mxu1 %v517_v22 }
  0x42   :  { %520 = vmatpush3.bf16.msra.mxu0 %v517_v22  ;;  %539 = vmatpush3.bf16.msra.mxu1 %v517_v22 }
  0x43   :  { %522 = vmatprep.subr.bf16.mxu0 %v521_v25  ;;  %532 = vmatprep.subr.bf16.mxu1 %v521_v25 }
  0x46   :  { %524 = vmatpush3.bf16.msra.mxu0 %v521_v25  ;;  %540 = vmatpush3.bf16.msra.mxu1 %v521_v25 }
  0x49   :  { %470 = vmatmul.mubr.f32.vlgmr.msra.gmra.mrb[0].mxu0 %v44_v26  ;;  %482 = vmatmul.mubr.f32.vlgmr.msra.gmra.mrb[0].mxu1 %v52_v27 }
  0x4a   :  { %472 = vmatprep.mubr.f32.mxu0 %v45_v28  ;;  %484 = vmatprep.mubr.f32.mxu1 %v53_v29 }
  0x4d   :  { %473 = vmatmul.mubr.f32.gmra.mrb[2].mxu0 %v46_v30  ;;  %485 = vmatmul.mubr.f32.gmra.mrb[2].mxu1 %v54_v31 }
  0x4e   :  { %475 = vmatprep.mubr.f32.mxu0 %v47_v32  ;;  %487 = vmatprep.mubr.f32.mxu1 %v55_v33 }
  0x51   :  { %476 = vmatmul.mubr.f32.gmra.mrb[4].mxu0 %v48_v34  ;;  %488 = vmatmul.mubr.f32.gmra.mrb[4].mxu1 %v56_v35 }
  0x52   :  { %478 = vmatprep.mubr.f32.mxu0 %v49_v36  ;;  %490 = vmatprep.mubr.f32.mxu1 %v57_v37 }
  0x55   :  { %479 = vmatmul.mubr.f32.gmra.mrb[6].mxu0 %v50_v38  ;;  %491 = vmatmul.mubr.f32.gmra.mrb[6].mxu1 %v58_v39 }
 0x11c   :  { %v471_v41 = vpop.f32.mrb[0].mxu0  ;;  %v483_v42 = vpop.f32.mrb[0].mxu1 }
 0x11d   :  { %v154_v43 = vadd.f32 %v471_v41, %v325_v40  ;;  %v194_v44 = vadd.f32 %v483_v42, %v325_v40  ;;  %v148_v45 = vpop.f32.mrb[1].mxu0  ;;  %v188_v46 = vpop.f32.mrb[1].mxu1 }
 0x11e   :  { %v149_v47 = vadd.f32 %v325_v40, %v148_v45  ;;  %v189_v48 = vadd.f32 %v325_v40, %v188_v46 }
 0x120   :  { %v361_v49 = vpack.c.bf16 %v154_v43, %v149_v47  ;;  %v381_v50 = vpack.c.bf16 %v194_v44, %v189_v48  ;;  %v474_v51 = vpop.f32.mrb[2].mxu0  ;;  %v486_v52 = vpop.f32.mrb[2].mxu1 }
 0x121   :  { %v164_v53 = vadd.f32 %v474_v51, %v325_v40  ;;  %v204_v54 = vadd.f32 %v486_v52, %v325_v40  ;;  %v158_v55 = vpop.f32.mrb[3].mxu0  ;;  %v198_v56 = vpop.f32.mrb[3].mxu1 }
 0x122   :  { %362 = vst [vmem:[#allocation7] sm:$0xff] %v361_v49   ;;  %401 = vst [vmem:[#allocation7 + $0x20] sm:$0xff] %v381_v50   ;;  %v159_v57 = vadd.f32 %v325_v40, %v158_v55  ;;  %v199_v58 = vadd.f32 %v325_v40, %v198_v56 }
 0x124   :  { %v366_v59 = vpack.c.bf16 %v164_v53, %v159_v57  ;;  %v386_v60 = vpack.c.bf16 %v204_v54, %v199_v58  ;;  %v477_v61 = vpop.f32.mrb[4].mxu0  ;;  %v489_v62 = vpop.f32.mrb[4].mxu1 }
 0x125   :  { %v174_v63 = vadd.f32 %v477_v61, %v325_v40  ;;  %v214_v0 = vadd.f32 %v489_v62, %v325_v40  ;;  %v168_v1 = vpop.f32.mrb[5].mxu0  ;;  %v208_v2 = vpop.f32.mrb[5].mxu1 }
 0x126   :  { %398 = vst [vmem:[#allocation7 + $0x8] sm:$0xff] %v366_v59   ;;  %402 = vst [vmem:[#allocation7 + $0x28] sm:$0xff] %v386_v60   ;;  %v169_v3 = vadd.f32 %v325_v40, %v168_v1  ;;  %v209_v4 = vadd.f32 %v325_v40, %v208_v2 }
 0x128   :  { %v371_v5 = vpack.c.bf16 %v174_v63, %v169_v3  ;;  %v391_v6 = vpack.c.bf16 %v214_v0, %v209_v4  ;;  %v480_v7 = vpop.f32.mrb[6].mxu0  ;;  %v492_v8 = vpop.f32.mrb[6].mxu1 }
 0x129   :  { %v184_v9 = vadd.f32 %v480_v7, %v325_v40  ;;  %v224_v10 = vadd.f32 %v492_v8, %v325_v40  ;;  %v178_v11 = vpop.f32.mrb[7].mxu0  ;;  %v218_v12 = vpop.f32.mrb[7].mxu1 }
 0x12a   :  { %399 = vst [vmem:[#allocation7 + $0x10] sm:$0xff] %v371_v5   ;;  %403 = vst [vmem:[#allocation7 + $0x30] sm:$0xff] %v391_v6   ;;  %v179_v13 = vadd.f32 %v325_v40, %v178_v11  ;;  %v219_v14 = vadd.f32 %v325_v40, %v218_v12 }
 0x12c   :  { %v376_v15 = vpack.c.bf16 %v184_v9, %v179_v13  ;;  %v396_v16 = vpack.c.bf16 %v224_v10, %v219_v14 }
 0x12e   :  { %400 = vst [vmem:[#allocation7 + $0x18] sm:$0xff] %v376_v15   ;;  %404 = vst [vmem:[#allocation7 + $0x38] sm:$0xff] %v396_v16  }
 0x12f   :  { %603 = shalt.err (!%p600_p6)
}
 0x130   :  { %s604_s15 = scalar_lea.hbm %s689_s3, 1024 }
 0x131   :  { %p605_p7 = scmp.ne.s32.totalorder %s689_s3, %s604_s15  ;;  %p608_p8 = scmp.lt.u32.totalorder %s604_s15, %s689_s3 }
 0x133   :  { %p610_p9 = pnand %p608_p8, %p605_p7 }
 0x135   :  { %613 = shalt.err (!%p610_p9)
}
 0x136   :  { %s625_s20 = smov 64   ;;  %s626_s21 = smov 4  }
 0x137   :  { %318 = dma.vmem_to_hbm [thread:$0]  %s313_s11, 1024, %s689_s3, [#allocation4], %s625_s20, %s625_s20, %s626_s21  }
 0x138   :  { %618 = dma.done.wait [#allocation4], 1024  }
 0x139   :  { %619 = vsyncadd [#allocation4], 4294966272 }
 0x13a   :  { %322 = vsyncpa [#allocation3], 1 }
 0x13b   :  { %323 = vsyncpa [#allocation6], 1 }
 0x13c   :  { %324 = vsyncpa [#allocation4], 1 }

</bundles_post_ra>
